<compile_context>
chip_gen: v7x
topology: tpu7x:2x2x1
jax: 0.10.0
libtpu: 0.0.40
codegen_flags: <defaults>
</compile_context>

<pallas_src>
import jax
import jax.numpy as jnp
from jax.experimental import pallas as pl
from jax.experimental.pallas import tpu as pltpu


def _round_up(x, m):
    return -(-x // m) * m


def _learned_kernel_body(enc_ref, w_ref, b_ref, o_ref):
    # enc_ref: (TB, S, H)   w_ref: (H, H)   b_ref: (1, H)   o_ref: (TB, 1)
    enc = enc_ref[...]
    x0 = enc[:, 0, :]                                   # (TB, H)
    x1 = enc[:, 1, :]                                   # (TB, H)

    # Standard-orientation matmul on the MXU, f32 accumulate, no transpose.
    y = jnp.dot(x0, w_ref[...], preferred_element_type=jnp.float32)   # (TB, H)

    # ((x1 @ W.T + b) * x0).sum(1)  ==  ((x0 @ W) * x1).sum(1) + (x0 * b).sum(1)
    prod = y * x1.astype(jnp.float32)
    bias_term = x0.astype(jnp.float32) * b_ref[...].astype(jnp.float32)
    out = jnp.sum(prod + bias_term, axis=1, keepdims=True)            # (TB, 1)
    o_ref[...] = out.astype(o_ref.dtype)


def _choose_batch_tile(B, S, H, itemsize):
    """Largest batch tile (<= 512, multiple of 8) such that the double-buffered
    encodings tile plus the VMEM-resident weight fit a conservative budget."""
    budget = 24 * 1024 * 1024
    s_pad = _round_up(S, 8)                 # sublane padding of trailing (S, H)
    h_pad = _round_up(H, 128)               # lane padding
    w_bytes = 2 * _round_up(H, 8) * h_pad * itemsize     # resident weight (2 bufs)
    tb = min(_round_up(B, 8), 512)
    while tb > 8 and 2 * tb * s_pad * h_pad * itemsize + w_bytes > budget:
        tb //= 2
    return tb


def learned_kernel_forward(encodings, weight, bias):
    """encodings: (B, S, H), weight: (H, H), bias: (H,) -> (B, 1)."""
    B, S, H = encodings.shape
    assert S >= 2
    itemsize = jnp.dtype(encodings.dtype).itemsize
    tb = _choose_batch_tile(B, S, H, itemsize)
    grid = (pl.cdiv(B, tb),)

    b2 = bias.reshape(1, H)                 # keep refs 2-D for TPU layout

    cost = pl.CostEstimate(
        flops=2 * B * H * H + 4 * B * H,
        transcendentals=0,
        bytes_accessed=(B * S * H + H * H + H + B) * itemsize,
    )

    return pl.pallas_call(
        _learned_kernel_body,
        out_shape=jax.ShapeDtypeStruct((B, 1), encodings.dtype),
        grid_spec=pltpu.PrefetchScalarGridSpec(
            num_scalar_prefetch=0,
            grid=grid,
            in_specs=[
                # Trailing block dims equal the full (S, H) extents, so the
                # (8,128) divisibility rule is trivially satisfied; seq rows
                # 0/1 are sliced inside the kernel (no HBM slice copies).
                pl.BlockSpec((tb, S, H), lambda i: (i, 0, 0)),
                pl.BlockSpec((H, H), lambda i: (0, 0)),   # weight: VMEM-resident
                pl.BlockSpec((1, H), lambda i: (0, 0)),   # bias:   VMEM-resident
            ],
            out_specs=pl.BlockSpec((tb, 1), lambda i: (i, 0)),
        ),
        compiler_params=pltpu.CompilerParams(
            dimension_semantics=("parallel",),            # batch tiles independent
        ),
        cost_estimate=cost,
    )(encodings, weight, b2)


def reference_forward(encodings, weight, bias):
    x1 = encodings[:, 1, :]
    x0 = encodings[:, 0, :]
    y = x1 @ weight.T + bias
    return jnp.sum(y * x0, axis=1, keepdims=True)


if __name__ == "__main__":
    key = jax.random.PRNGKey(0)
    k_enc, k_w, k_b = jax.random.split(key, 3)

    B, S, H = 8, 3, 32   # batch=8, seq=3 (>=2), ffn_hidden_size=32
    encodings = jax.random.normal(k_enc, (B, S, H), dtype=jnp.float32)

    # Deterministic param init (mimics nn.Linear uniform(-1/sqrt(H), 1/sqrt(H)))
    bound = 1.0 / (H ** 0.5)
    weight = jax.random.uniform(k_w, (H, H), minval=-bound, maxval=bound,
                                dtype=jnp.float32)
    bias = jax.random.uniform(k_b, (H,), minval=-bound, maxval=bound,
                              dtype=jnp.float32)

    out = learned_kernel_forward(encodings, weight, bias)
    out = jax.block_until_ready(out)

    ref = reference_forward(encodings, weight, bias)
    assert out.shape == (B, 1)
    assert jnp.allclose(out, ref, atol=1e-4, rtol=1e-4)

    print("KERNEL_OK")
</pallas_src>

<mosaic_0001>
module attributes {stable_mosaic.version = 11 : i64} {
  func.func @_learned_kernel_body(%arg0: i32, %arg1: memref<8x3x32xf32, #tpu.memory_space<vmem>>, %arg2: memref<32x32xf32, #tpu.memory_space<vmem>>, %arg3: memref<1x32xf32, #tpu.memory_space<vmem>>, %arg4: memref<8x1xf32, #tpu.memory_space<vmem>>) attributes {dimension_semantics = [#tpu.dimension_semantics<parallel>], iteration_bounds = array<i64: 1>, scalar_prefetch = 0 : i64, scratch_operands = 0 : i64, tpu.core_type = #tpu.core_type<tc>, window_params = [{transform_indices = @transform_0, window_bounds = array<i64: 8, 3, 32>}, {pipeline_mode = #tpu.pipeline_mode<synchronous>, transform_indices = @transform_1, window_bounds = array<i64: 32, 32>}, {pipeline_mode = #tpu.pipeline_mode<synchronous>, transform_indices = @transform_2, window_bounds = array<i64: 1, 32>}, {transform_indices = @transform_3, window_bounds = array<i64: 8, 1>}]} {
    %c0 = arith.constant 0 : index
    %c0_0 = arith.constant 0 : index
    %c0_1 = arith.constant 0 : index
    %0 = vector.load %arg1[%c0, %c0_0, %c0_1] : memref<8x3x32xf32, #tpu.memory_space<vmem>>, vector<8x3x32xf32>
    %1 = vector.extract_strided_slice %0 {offsets = [0, 0, 0], sizes = [8, 1, 32], strides = [1, 1, 1]} : vector<8x3x32xf32> to vector<8x1x32xf32>
    %2 = vector.shape_cast %1 : vector<8x1x32xf32> to vector<8x32xf32>
    %3 = vector.extract_strided_slice %0 {offsets = [0, 1, 0], sizes = [8, 1, 32], strides = [1, 1, 1]} : vector<8x3x32xf32> to vector<8x1x32xf32>
    %4 = vector.shape_cast %3 : vector<8x1x32xf32> to vector<8x32xf32>
    %c0_2 = arith.constant 0 : index
    %c0_3 = arith.constant 0 : index
    %5 = vector.load %arg2[%c0_2, %c0_3] : memref<32x32xf32, #tpu.memory_space<vmem>>, vector<32x32xf32>
    %cst = arith.constant dense<0.000000e+00> : vector<8x32xf32>
    %6 = tpu.matmul %2, %5, %cst {dimension_numbers = #tpu.dot_dimension_numbers<[1], [0], [0], [1], [0, 0, 1, 1], [], []>} : vector<8x32xf32>, vector<32x32xf32>, vector<8x32xf32> -> vector<8x32xf32>
    %7 = arith.mulf %6, %4 : vector<8x32xf32>
    %c0_4 = arith.constant 0 : index
    %c0_5 = arith.constant 0 : index
    %8 = vector.load %arg3[%c0_4, %c0_5] : memref<1x32xf32, #tpu.memory_space<vmem>>, vector<1x32xf32>
    %9 = vector.broadcast %8 : vector<1x32xf32> to vector<8x32xf32>
    %10 = arith.mulf %2, %9 : vector<8x32xf32>
    %11 = arith.addf %7, %10 : vector<8x32xf32>
    %cst_6 = arith.constant dense<0.000000e+00> : vector<8xf32>
    %12 = vector.multi_reduction <add>, %11, %cst_6 [1] : vector<8x32xf32> to vector<8xf32>
    %13 = vector.shape_cast %12 : vector<8xf32> to vector<8x1xf32>
    %c0_7 = arith.constant 0 : index
    %c0_8 = arith.constant 0 : index
    %14 = vector.load %arg4[%c0_7, %c0_8] : memref<8x1xf32, #tpu.memory_space<vmem>>, vector<8x1xf32>
    tpu.vector_store %arg4[%c0_7, %c0_8], %13 {strides = array<i32>} : memref<8x1xf32, #tpu.memory_space<vmem>>, vector<8x1xf32>,
    return
  }
  func.func @transform_0(%arg0: i32) -> (i32, i32, i32) {
    %c0_i32 = arith.constant 0 : i32
    %c0_i32_0 = arith.constant 0 : i32
    %c0_i32_1 = arith.constant 0 : i32
    return %arg0, %c0_i32, %c0_i32_0 : i32, i32, i32
  }
  func.func @transform_1(%arg0: i32) -> (i32, i32) {
    %c0_i32 = arith.constant 0 : i32
    %c0_i32_0 = arith.constant 0 : i32
    %c0_i32_1 = arith.constant 0 : i32
    return %c0_i32, %c0_i32_0 : i32, i32
  }
  func.func @transform_2(%arg0: i32) -> (i32, i32) {
    %c0_i32 = arith.constant 0 : i32
    %c0_i32_0 = arith.constant 0 : i32
    %c0_i32_1 = arith.constant 0 : i32
    return %c0_i32, %c0_i32_0 : i32, i32
  }
  func.func @transform_3(%arg0: i32) -> (i32, i32) {
    %c0_i32 = arith.constant 0 : i32
    %c0_i32_0 = arith.constant 0 : i32
    return %arg0, %c0_i32 : i32, i32
  }
}

</mosaic_0001>

<bundles_post_ra>
// kernel: tpu_custom_call.1
= control target key start
LH: loop header
LB: loop body
LE: loop exit
PB: predicated region body
PF: predicated region fallthrough
CT: control target
= control target key end

     0   :  { %v219_v0 = vmov 0.0|0.0   ;;  %vm220_vm0 = vmmov 0   ;;  %v221_v4 = vmov 0.0   ;;  %vm35_vm1 = vcmask 1041409   ;;  %s307_s1 = inlined_call_operand.vmem [shape: f32[32,32], index: 1, kind: input, shape index: {}]   ;;  %s308_s0 = inlined_call_operand.vmem [shape: f32[8,3,32], index: 0, kind: input, shape index: {}]   ;;  %s309_s2 = inlined_call_operand.vmem [shape: f32[1,32], index: 2, kind: input, shape index: {}]   ;;  %s310_s3 = inlined_call_operand.vmem [shape: f32[8,1], index: 3, kind: output, shape index: {}]  }
   0x1   :  { %210 = vmatprep.subr.bf16.mxu0 %v219_v0  ;;  %v22_v1 = vld [vmem:[%s307_s1] sm:$0xff]  ;;  %v23_v2 = vld [vmem:[%s307_s1 + $0x8] sm:$0xff]  ;;  %v24_v3 = vld [vmem:[%s307_s1 + $0x10] sm:$0xff]  ;;  %207 = vmatprep.mubr.msk.f32.mxu0 %vm220_vm0, %v221_v4  ;;  %vm38_vm2 = vcmask 1042434   ;;  %vm41_vm3 = vcmask 1043459   ;;  %vm44_vm4 = vcmask 1044484  }
   0x2   :  { %v211_v5 = vpack.c.bf16 %v23_v2, %v22_v1  ;;  %v25_v6 = vld [vmem:[%s307_s1 + $0x18] sm:$0xff]  ;;  %v15_v7 = vld [vmem:[%s308_s0 + $0x4] sm:$0x7]  ;;  %v16_v8 = vld [vmem:[%s308_s0 + $0x8] sm:$0x7]  ;;  %vm47_vm5 = vcmask 1045509  }
   0x3   :  { %v17_v9 = vld [vmem:[%s308_s0 + $0xc] sm:$0x7]  ;;  %v18_v10 = vld [vmem:[%s308_s0 + $0x10] sm:$0x7]  ;;  %v214_v11 = vpack.c.bf16 %v25_v6, %v24_v3  ;;  %v14_v12 = vld [vmem:[%s308_s0] sm:$0x7] }
   0x4   :  { %212 = vmatpush3.bf16.msra.mxu0 %v211_v5  ;;  %v19_v13 = vld [vmem:[%s308_s0 + $0x14] sm:$0x7]  ;;  %v20_v14 = vld [vmem:[%s308_s0 + $0x18] sm:$0x7]  ;;  %v34_v15 = vrot.slane %v15_v7, 7  ;;  %v37_v16 = vrot.slane %v16_v8, 6 }
   0x5   :  { %213 = vmatprep.subr.bf16.mxu0 %v219_v0  ;;  %v40_v17 = vrot.slane %v17_v9, 5  ;;  %v21_v18 = vld [vmem:[%s308_s0 + $0x1c] sm:$0x7]  ;;  %v43_v19 = vrot.slane %v18_v10, 4  ;;  %v46_v21 = vrot.slane %v19_v13, 3  ;;  %v49_v23 = vrot.slane %v20_v14, 2 }
   0x6   :  { %v36_v20 = vsel %vm35_vm1, %v34_v15, %v14_v12  ;;  %vm50_vm6 = vcmask 1046534   ;;  %v52_v25 = vrot.slane %v21_v18, 1  ;;  %vm53_vm7 = vcmask 1047559   ;;  %v193_v30 = vld [vmem:[%s309_s2] ss:$0 sm:$0xff] }
   0x7   :  { %v39_v22 = vsel %vm38_vm2, %v37_v16, %v36_v20  ;;  %vm55_vm8 = vcmask 261120   ;;  %v152_v31 = vmul.f32 %v193_v30, %v15_v7  ;;  %v128_v32 = vrot.slane %v14_v12, 1 }
   0x8   :  { %215 = vmatpush3.bf16.msra.mxu0 %v214_v11  ;;  %v42_v24 = vsel %vm41_vm3, %v40_v17, %v39_v22  ;;  %v153_v33 = vmul.f32 %v193_v30, %v16_v8  ;;  %v151_v34 = vmul.f32 %v193_v30, %v14_v12  ;;  %v130_v36 = vrot.slane %v16_v8, 7 }
   0x9   :  { %v45_v26 = vsel %vm44_vm4, %v43_v19, %v42_v24  ;;  %v167_v35 = vrot.slane %v152_v31, 7  ;;  %v129_v37 = vsel %vm35_vm1, %v15_v7, %v128_v32  ;;  %v154_v38 = vmul.f32 %v193_v30, %v17_v9 }
   0xa   :  { %v48_v27 = vsel %vm47_vm5, %v46_v21, %v45_v26  ;;  %v169_v39 = vrot.slane %v153_v33, 6  ;;  %v132_v40 = vrot.slane %v17_v9, 6  ;;  %v131_v42 = vsel %vm38_vm2, %v130_v36, %v129_v37 }
   0xb   :  { %v51_v28 = vsel %vm50_vm6, %v49_v23, %v48_v27  ;;  %v168_v41 = vsel %vm35_vm1, %v167_v35, %v151_v34  ;;  %v155_v43 = vmul.f32 %v193_v30, %v18_v10  ;;  %v171_v44 = vrot.slane %v154_v38, 5 }
   0xc   :  { %v54_v29 = vsel %vm53_vm7, %v52_v25, %v51_v28  ;;  %v134_v45 = vrot.slane %v18_v10, 5  ;;  %v170_v46 = vsel %vm38_vm2, %v169_v39, %v168_v41  ;;  %v133_v47 = vsel %vm41_vm3, %v132_v40, %v131_v42 }
   0xd   :  { %208 = vmatmul.mubr.msk.f32.vlgmr.msra.gmra.mrb[0].mxu0 %vm55_vm8, %v54_v29  ;;  %v156_v48 = vmul.f32 %v193_v30, %v19_v13  ;;  %v173_v49 = vrot.slane %v155_v43, 4  ;;  %v136_v50 = vrot.slane %v19_v13, 4  ;;  %v172_v51 = vsel %vm41_vm3, %v171_v44, %v170_v46 }
   0xe   :  { %v135_v52 = vsel %vm44_vm4, %v134_v45, %v133_v47  ;;  %v157_v53 = vmul.f32 %v193_v30, %v20_v14  ;;  %v138_v55 = vrot.slane %v20_v14, 3  ;;  %v158_v58 = vmul.f32 %v193_v30, %v21_v18 }
   0xf   :  { %v175_v54 = vrot.slane %v156_v48, 3  ;;  %v174_v56 = vsel %vm44_vm4, %v173_v49, %v172_v51  ;;  %v137_v57 = vsel %vm47_vm5, %v136_v50, %v135_v52  ;;  %v140_v60 = vrot.slane %v21_v18, 2 }
  0x10   :  { %v177_v59 = vrot.slane %v157_v53, 2  ;;  %v139_v62 = vsel %vm50_vm6, %v138_v55, %v137_v57  ;;  %v179_v63 = vrot.slane %v158_v58, 1  ;;  %vm186_vm9 = vcmask 7168  }
  0x11   :  { %v176_v61 = vsel %vm47_vm5, %v175_v54, %v174_v56  ;;  %v141_v1 = vsel %vm53_vm7, %v140_v60, %v139_v62 }
  0x12   :  { %v178_v0 = vsel %vm50_vm6, %v177_v59, %v176_v61 }
  0x13   :  { %v180_v3 = vsel %vm53_vm7, %v179_v63, %v178_v0 }
  0xe0   :  { %v124_v2 = vpop.f32.mrb[0].mxu0 }
  0xe1   :  { %v143_v4 = vmul.f32 %v141_v1, %v124_v2  ;;  %v209_v5 = vpop.f32.mrb[1].mxu0 }
  0xe3   :  { %v182_v6 = vadd.f32 %v180_v3, %v143_v4 }
  0xe5   :  { %v183_v7 = vsel %vm55_vm8, %v182_v6, 0.0 }
  0xe6   :  { %184 = vadd.xlane.f32.xlu0 %v183_v7 }
 0x173   :  { %v185_v8 = vpop.xlane.xlu0 %184 }
 0x174   :  { %187 = vst.msk [vmem:[%s310_s3] sm:$0xff] %vm186_vm9, %v185_v8 }

</bundles_post_ra>
